<compile_context>
chip_gen: v6e
topology: v6e:2x2x1
jax: 0.10.0
libtpu: 0.0.40
codegen_flags: <defaults>
</compile_context>

<pallas_src>
import functools

import jax
import jax.numpy as jnp
from jax.experimental import pallas as pl
from jax.experimental.pallas import tpu as pltpu


HIDDEN = 200


def _round_up(x: int, m: int) -> int:
    return ((x + m - 1) // m) * m


def _mlp_kernel(x_ref, w1_ref, b1_ref, w2_ref, b2_ref, w3_ref, b3_ref, o_ref):
    # fc1 + relu  (bf16 MXU operands, f32 accumulate, f32 elementwise)
    h1 = jnp.dot(x_ref[...].astype(jnp.bfloat16), w1_ref[...],
                 preferred_element_type=jnp.float32)
    h1 = jnp.maximum(h1 + b1_ref[...], 0.0)
    # fc2 + relu
    h2 = jnp.dot(h1.astype(jnp.bfloat16), w2_ref[...],
                 preferred_element_type=jnp.float32)
    h2 = jnp.maximum(h2 + b2_ref[...], 0.0)
    # fc3 (no activation); store in output dtype (bf16) to halve HBM writeback.
    out = jnp.dot(h2.astype(jnp.bfloat16), w3_ref[...],
                  preferred_element_type=jnp.float32) + b3_ref[...]
    o_ref[...] = out.astype(o_ref.dtype)


def prepare_params(w1, b1, w2, b2, w3, b3):
    """One-time weight prep (call at model setup, NOT per forward).

    Pads hidden / output feature dims to multiples of 128 (lane-dense, unmasked
    MXU tiles and stores) and casts weights to bf16.  Zero padding is exact:
    relu(0)=0 and zero weight rows/cols contribute nothing.
    Weights are (in_features, out_features), i.e. transposed vs. PyTorch.
    Returns (padded_param_tuple, d_out)."""
    h = w1.shape[1]
    d_out = w3.shape[1]
    hp = _round_up(h, 128)        # 200 -> 256
    dop = _round_up(d_out, 128)   # 10  -> 128

    bf16 = jnp.bfloat16
    f32 = jnp.float32
    w1p = jnp.pad(w1, ((0, 0), (0, hp - h))).astype(bf16)
    b1p = jnp.pad(b1.reshape(1, -1), ((0, 0), (0, hp - h))).astype(f32)
    w2p = jnp.pad(w2, ((0, hp - h), (0, hp - h))).astype(bf16)
    b2p = jnp.pad(b2.reshape(1, -1), ((0, 0), (0, hp - h))).astype(f32)
    w3p = jnp.pad(w3, ((0, hp - h), (0, dop - d_out))).astype(bf16)
    b3p = jnp.pad(b3.reshape(1, -1), ((0, 0), (0, dop - d_out))).astype(f32)
    return (w1p, b1p, w2p, b2p, w3p, b3p), d_out


@functools.partial(jax.jit, static_argnames=("d_out", "tm"))
def two_hidden_layer_fc(x, w1p, b1p, w2p, b2p, w3p, b3p, *, d_out, tm=1024):
    """Fused forward of TwoHiddenLayerFc: relu(fc1) -> relu(fc2) -> fc3.

    x:   (B, D_in) float32 (or bf16)
    w*p / b*p: pre-padded params from prepare_params()
    returns (B, d_out) float32
    """
    B, d_in = x.shape
    hp = w1p.shape[1]
    dop = w3p.shape[1]

    # Batch tile: multiple of 8, at most tm, and <= ceil(B/2) so the parallel
    # grid axis has >=2 steps whenever possible (feeds both v7x TensorCores).
    tm_eff = max(8, min(tm, _round_up(pl.cdiv(B, 2), 8)))
    grid = (pl.cdiv(B, tm_eff),)   # ragged last block; no x pad copy

    x_spec = pl.BlockSpec((tm_eff, d_in), lambda i: (i, 0))
    out_spec = pl.BlockSpec((tm_eff, dop), lambda i: (i, 0))
    # Weights / biases resident in VMEM across all grid steps (constant index).
    resident = lambda shape: pl.BlockSpec(shape, lambda i: (0, 0))

    flops = 2 * B * (d_in * hp + hp * hp + hp * dop)
    bytes_accessed = (
        B * d_in * x.dtype.itemsize            # stream x in
        + B * dop * 2                          # bf16 padded output out
        + (w1p.size + w2p.size + w3p.size) * 2 # bf16 weights (once)
        + (b1p.size + b2p.size + b3p.size) * 4 # f32 biases (once)
    )

    out_padded = pl.pallas_call(
        _mlp_kernel,
        out_shape=jax.ShapeDtypeStruct((B, dop), jnp.bfloat16),
        grid=grid,
        in_specs=[
            x_spec,
            resident(w1p.shape), resident(b1p.shape),
            resident(w2p.shape), resident(b2p.shape),
            resident(w3p.shape), resident(b3p.shape),
        ],
        out_specs=out_spec,
        compiler_params=pltpu.CompilerParams(
            dimension_semantics=("parallel",),
        ),
        cost_estimate=pl.CostEstimate(
            flops=flops, transcendentals=0, bytes_accessed=bytes_accessed),
    )(x, w1p, b1p, w2p, b2p, w3p, b3p)

    # Slice valid logits, return f32 (bf16 writeback only affects the store).
    return out_padded[:, :d_out].astype(jnp.float32)


def init_linear(key, fan_in, fan_out):
    """PyTorch-nn.Linear-style init (uniform +/- 1/sqrt(fan_in)).

    Weight returned already transposed to (fan_in, fan_out)."""
    kw, kb = jax.random.split(key)
    bound = 1.0 / jnp.sqrt(jnp.float32(fan_in))
    w = jax.random.uniform(kw, (fan_in, fan_out), jnp.float32, -bound, bound)
    b = jax.random.uniform(kb, (1, fan_out), jnp.float32, -bound, bound)
    return w, b


def reference_forward(x, w1, b1, w2, b2, w3, b3):
    """Pure-JAX reference (bf16 MXU operands, f32 accumulation, f32 epilogue)."""
    bf = jnp.bfloat16
    h1 = jnp.maximum(
        jnp.dot(x.astype(bf), w1.astype(bf),
                preferred_element_type=jnp.float32) + b1, 0.0)
    h2 = jnp.maximum(
        jnp.dot(h1.astype(bf), w2.astype(bf),
                preferred_element_type=jnp.float32) + b2, 0.0)
    return jnp.dot(h2.astype(bf), w3.astype(bf),
                   preferred_element_type=jnp.float32) + b3


if __name__ == "__main__":
    # Small shapes consistent with the module: input_shape=32, out_dim=10, batch=8.
    B, D_IN, D_OUT = 8, 32, 10

    key = jax.random.PRNGKey(0)
    kx, k1, k2, k3 = jax.random.split(key, 4)

    x = jax.random.normal(kx, (B, D_IN), jnp.float32)
    w1, b1 = init_linear(k1, D_IN, HIDDEN)
    w2, b2 = init_linear(k2, HIDDEN, HIDDEN)
    w3, b3 = init_linear(k3, HIDDEN, D_OUT)

    # One-time weight prep (outside the per-call hot path).
    params, d_out = prepare_params(w1, b1, w2, b2, w3, b3)
    params = jax.block_until_ready(params)

    out = two_hidden_layer_fc(x, *params, d_out=d_out)
    out = jax.block_until_ready(out)

    ref = reference_forward(x, w1, b1, w2, b2, w3, b3)
    assert out.shape == (B, D_OUT)
    assert out.dtype == jnp.float32
    assert jnp.allclose(out, ref, atol=1e-2, rtol=1e-2), (
        float(jnp.max(jnp.abs(out - ref))))

    print("KERNEL_OK")
</pallas_src>

<mosaic_0001>
module attributes {stable_mosaic.version = 11 : i64} {
  func.func @_mlp_kernel(%arg0: i32, %arg1: memref<8x32xf32, #tpu.memory_space<vmem>>, %arg2: memref<32x256xbf16, #tpu.memory_space<vmem>>, %arg3: memref<1x256xf32, #tpu.memory_space<vmem>>, %arg4: memref<256x256xbf16, #tpu.memory_space<vmem>>, %arg5: memref<1x256xf32, #tpu.memory_space<vmem>>, %arg6: memref<256x128xbf16, #tpu.memory_space<vmem>>, %arg7: memref<1x128xf32, #tpu.memory_space<vmem>>, %arg8: memref<8x128xbf16, #tpu.memory_space<vmem>>) attributes {dimension_semantics = [#tpu.dimension_semantics<parallel>], iteration_bounds = array<i64: 1>, scalar_prefetch = 0 : i64, scratch_operands = 0 : i64, tpu.core_type = #tpu.core_type<tc>, window_params = [{transform_indices = @transform_0, window_bounds = array<i64: 8, 32>}, {pipeline_mode = #tpu.pipeline_mode<synchronous>, transform_indices = @transform_1, window_bounds = array<i64: 32, 256>}, {pipeline_mode = #tpu.pipeline_mode<synchronous>, transform_indices = @transform_2, window_bounds = array<i64: 1, 256>}, {pipeline_mode = #tpu.pipeline_mode<synchronous>, transform_indices = @transform_3, window_bounds = array<i64: 256, 256>}, {pipeline_mode = #tpu.pipeline_mode<synchronous>, transform_indices = @transform_4, window_bounds = array<i64: 1, 256>}, {pipeline_mode = #tpu.pipeline_mode<synchronous>, transform_indices = @transform_5, window_bounds = array<i64: 256, 128>}, {pipeline_mode = #tpu.pipeline_mode<synchronous>, transform_indices = @transform_6, window_bounds = array<i64: 1, 128>}, {transform_indices = @transform_7, window_bounds = array<i64: 8, 128>}]} {
    %c0 = arith.constant 0 : index
    %c0_0 = arith.constant 0 : index
    %0 = vector.load %arg1[%c0, %c0_0] : memref<8x32xf32, #tpu.memory_space<vmem>>, vector<8x32xf32>
    %1 = arith.truncf %0 : vector<8x32xf32> to vector<8x32xbf16>
    %c0_1 = arith.constant 0 : index
    %c0_2 = arith.constant 0 : index
    %2 = vector.load %arg2[%c0_1, %c0_2] : memref<32x256xbf16, #tpu.memory_space<vmem>>, vector<32x256xbf16>
    %cst = arith.constant dense<0.000000e+00> : vector<8x256xf32>
    %3 = tpu.matmul %1, %2, %cst {dimension_numbers = #tpu.dot_dimension_numbers<[1], [0], [0], [1], [0, 0, 1, 1], [], []>} : vector<8x32xbf16>, vector<32x256xbf16>, vector<8x256xf32> -> vector<8x256xf32>
    %c0_3 = arith.constant 0 : index
    %c0_4 = arith.constant 0 : index
    %4 = vector.load %arg3[%c0_3, %c0_4] : memref<1x256xf32, #tpu.memory_space<vmem>>, vector<1x256xf32>
    %5 = vector.broadcast %4 : vector<1x256xf32> to vector<8x256xf32>
    %6 = arith.addf %3, %5 : vector<8x256xf32>
    %cst_5 = arith.constant 0.000000e+00 : f32
    %7 = vector.broadcast %cst_5 : f32 to vector<8x256xf32>
    %8 = arith.maximumf %6, %7 : vector<8x256xf32>
    %9 = arith.truncf %8 : vector<8x256xf32> to vector<8x256xbf16>
    %c0_6 = arith.constant 0 : index
    %c0_7 = arith.constant 0 : index
    %10 = vector.load %arg4[%c0_6, %c0_7] : memref<256x256xbf16, #tpu.memory_space<vmem>>, vector<256x256xbf16>
    %cst_8 = arith.constant dense<0.000000e+00> : vector<8x256xf32>
    %11 = tpu.matmul %9, %10, %cst_8 {dimension_numbers = #tpu.dot_dimension_numbers<[1], [0], [0], [1], [0, 0, 1, 1], [], []>} : vector<8x256xbf16>, vector<256x256xbf16>, vector<8x256xf32> -> vector<8x256xf32>
    %c0_9 = arith.constant 0 : index
    %c0_10 = arith.constant 0 : index
    %12 = vector.load %arg5[%c0_9, %c0_10] : memref<1x256xf32, #tpu.memory_space<vmem>>, vector<1x256xf32>
    %13 = vector.broadcast %12 : vector<1x256xf32> to vector<8x256xf32>
    %14 = arith.addf %11, %13 : vector<8x256xf32>
    %cst_11 = arith.constant 0.000000e+00 : f32
    %15 = vector.broadcast %cst_11 : f32 to vector<8x256xf32>
    %16 = arith.maximumf %14, %15 : vector<8x256xf32>
    %17 = arith.truncf %16 : vector<8x256xf32> to vector<8x256xbf16>
    %c0_12 = arith.constant 0 : index
    %c0_13 = arith.constant 0 : index
    %18 = vector.load %arg6[%c0_12, %c0_13] : memref<256x128xbf16, #tpu.memory_space<vmem>>, vector<256x128xbf16>
    %cst_14 = arith.constant dense<0.000000e+00> : vector<8x128xf32>
    %19 = tpu.matmul %17, %18, %cst_14 {dimension_numbers = #tpu.dot_dimension_numbers<[1], [0], [0], [1], [0, 0, 1, 1], [], []>} : vector<8x256xbf16>, vector<256x128xbf16>, vector<8x128xf32> -> vector<8x128xf32>
    %c0_15 = arith.constant 0 : index
    %c0_16 = arith.constant 0 : index
    %20 = vector.load %arg7[%c0_15, %c0_16] : memref<1x128xf32, #tpu.memory_space<vmem>>, vector<1x128xf32>
    %21 = vector.broadcast %20 : vector<1x128xf32> to vector<8x128xf32>
    %22 = arith.addf %19, %21 : vector<8x128xf32>
    %23 = arith.truncf %22 : vector<8x128xf32> to vector<8x128xbf16>
    %c0_17 = arith.constant 0 : index
    %c0_18 = arith.constant 0 : index
    %24 = vector.load %arg8[%c0_17, %c0_18] : memref<8x128xbf16, #tpu.memory_space<vmem>>, vector<8x128xbf16>
    tpu.vector_store %arg8[%c0_17, %c0_18], %23 {strides = array<i32>} : memref<8x128xbf16, #tpu.memory_space<vmem>>, vector<8x128xbf16>,
    return
  }
  func.func @transform_0(%arg0: i32) -> (i32, i32) {
    %c0_i32 = arith.constant 0 : i32
    %c0_i32_0 = arith.constant 0 : i32
    return %arg0, %c0_i32 : i32, i32
  }
  func.func @transform_1(%arg0: i32) -> (i32, i32) {
    %c0_i32 = arith.constant 0 : i32
    %c0_i32_0 = arith.constant 0 : i32
    %c0_i32_1 = arith.constant 0 : i32
    return %c0_i32, %c0_i32_0 : i32, i32
  }
  func.func @transform_2(%arg0: i32) -> (i32, i32) {
    %c0_i32 = arith.constant 0 : i32
    %c0_i32_0 = arith.constant 0 : i32
    %c0_i32_1 = arith.constant 0 : i32
    return %c0_i32, %c0_i32_0 : i32, i32
  }
  func.func @transform_3(%arg0: i32) -> (i32, i32) {
    %c0_i32 = arith.constant 0 : i32
    %c0_i32_0 = arith.constant 0 : i32
    %c0_i32_1 = arith.constant 0 : i32
    return %c0_i32, %c0_i32_0 : i32, i32
  }
  func.func @transform_4(%arg0: i32) -> (i32, i32) {
    %c0_i32 = arith.constant 0 : i32
    %c0_i32_0 = arith.constant 0 : i32
    %c0_i32_1 = arith.constant 0 : i32
    return %c0_i32, %c0_i32_0 : i32, i32
  }
  func.func @transform_5(%arg0: i32) -> (i32, i32) {
    %c0_i32 = arith.constant 0 : i32
    %c0_i32_0 = arith.constant 0 : i32
    %c0_i32_1 = arith.constant 0 : i32
    return %c0_i32, %c0_i32_0 : i32, i32
  }
  func.func @transform_6(%arg0: i32) -> (i32, i32) {
    %c0_i32 = arith.constant 0 : i32
    %c0_i32_0 = arith.constant 0 : i32
    %c0_i32_1 = arith.constant 0 : i32
    return %c0_i32, %c0_i32_0 : i32, i32
  }
  func.func @transform_7(%arg0: i32) -> (i32, i32) {
    %c0_i32 = arith.constant 0 : i32
    %c0_i32_0 = arith.constant 0 : i32
    return %arg0, %c0_i32 : i32, i32
  }
}

</mosaic_0001>

<bundles_post_ra>
// kernel: two_hidden_layer_fc.1
= control target key start
LH: loop header
LB: loop body
LE: loop exit
PB: predicated region body
PF: predicated region fallthrough
CT: control target
= control target key end

     0   :  { %12 = vsyncpa [#allocation3], 0  ;;  %s914_s0 = inlined_call_operand.hbm [shape: f32[8,32], index: 0, kind: input, shape index: {}]   ;;  %s915_s1 = inlined_call_operand.hbm [shape: bf16[32,256], index: 1, kind: input, shape index: {}]   ;;  %s916_s2 = inlined_call_operand.vmem [shape: f32[1,256], index: 2, kind: input, shape index: {}]   ;;  %s917_s3 = inlined_call_operand.hbm [shape: bf16[256,256], index: 3, kind: input, shape index: {}]   ;;  %s918_s4 = inlined_call_operand.vmem [shape: f32[1,256], index: 4, kind: input, shape index: {}]   ;;  %s919_s5 = inlined_call_operand.hbm [shape: bf16[256,128], index: 5, kind: input, shape index: {}]   ;;  %s920_s6 = inlined_call_operand.vmem [shape: f32[1,128], index: 6, kind: input, shape index: {}]   ;;  %s921_s7 = inlined_call_operand.vmem [shape: bf16[8,128], index: 7, kind: output, shape index: {}]  }
   0x1   :  { %13 = vsyncpa [#allocation5], 0 }
   0x2   :  { %14 = vsyncpa [#allocation8], 0  ;;  %s841_s24 = smov [#allocation4]  }
   0x3   :  { %s30_s25 = sshll.u32 %s841_s24, 4  ;;  %s31_s25 = int_to_ptr.vmem [resolvable:$true] %s30_s25 }
   0x4   :  { %s763_s26 = scalar_lea.vmem %s31_s25, 512  ;;  %p768_p1 = scmp.lt.s32.totalorder %s31_s25, %s31_s25 }
   0x5   :  { %p764_p0 = scmp.ne.s32.totalorder %s31_s25, %s763_s26  ;;  %p769_p2 = scmp.lt.s32.totalorder %s763_s26, %s763_s26 }
   0x7   :  { %p770_p3 = por %p769_p2, %p768_p1 }
   0x9   :  { %p771_p4 = pnand %p770_p3, %p764_p0 }
   0xb   :  { %774 = shalt.err (!%p771_p4)
}
   0xc   :  { %s842_s27 = smov 128   ;;  %s843_s28 = smov 8  }
   0xd   :  { %36 = dma.hbm_to_vmem [thread:$0]  %s915_s1, 512, %s31_s25, [#allocation5], %s842_s27, %s842_s27, %s843_s28  }
   0xe   :  { %s844_s8 = smov [#allocation2]   ;;  %s845_s10 = smov [#allocation6]  }
   0xf   :  { %s21_s9 = sshll.u32 %s844_s8, 4  ;;  %s44_s11 = sshll.u32 %s845_s10, 4  ;;  %s22_s9 = int_to_ptr.vmem [resolvable:$true] %s21_s9  ;;  %s45_s11 = int_to_ptr.vmem [resolvable:$true] %s44_s11 }
  0x10   :  { %s783_s12 = scalar_lea.vmem %s22_s9, 128  ;;  %p788_p6 = scmp.lt.s32.totalorder %s22_s9, %s22_s9 }
  0x11   :  { %p784_p5 = scmp.ne.s32.totalorder %s22_s9, %s783_s12  ;;  %p789_p7 = scmp.lt.s32.totalorder %s783_s12, %s783_s12 }
  0x13   :  { %p790_p8 = por %p789_p7, %p788_p6 }
  0x15   :  { %p791_p9 = pnand %p790_p8, %p784_p5 }
  0x17   :  { %794 = shalt.err (!%p791_p9)
}
  0x18   :  { %24 = dma.hbm_to_vmem [thread:$0]  %s914_s0, 128, %s22_s9, [#allocation3]  }
  0x19   :  { %s803_s15 = scalar_lea.vmem %s45_s11, 4096  ;;  %p808_p11 = scmp.lt.s32.totalorder %s45_s11, %s45_s11 }
  0x1a   :  { %p804_p10 = scmp.ne.s32.totalorder %s45_s11, %s803_s15  ;;  %p809_p12 = scmp.lt.s32.totalorder %s803_s15, %s803_s15 }
  0x1c   :  { %p810_p13 = por %p809_p12, %p808_p11 }
  0x1e   :  { %p811_p0 = pnand %p810_p13, %p804_p10 }
  0x20   :  { %814 = shalt.err (!%p811_p0)
}
  0x21   :  { %50 = dma.hbm_to_vmem [thread:$0]  %s917_s3, 4096, %s45_s11, [#allocation5], %s842_s27, %s842_s27, %s843_s28  }
  0x22   :  { %s846_s17 = smov [#allocation7]  }
  0x23   :  { %s58_s18 = sshll.u32 %s846_s17, 4  ;;  %s59_s18 = int_to_ptr.vmem [resolvable:$true] %s58_s18 }
  0x24   :  { %s823_s19 = scalar_lea.vmem %s59_s18, 2048  ;;  %p828_p2 = scmp.lt.s32.totalorder %s59_s18, %s59_s18 }
  0x25   :  { %p824_p1 = scmp.ne.s32.totalorder %s59_s18, %s823_s19  ;;  %p829_p3 = scmp.lt.s32.totalorder %s823_s19, %s823_s19 }
  0x27   :  { %p830_p4 = por %p829_p3, %p828_p2 }
  0x29   :  { %p831_p5 = pnand %p830_p4, %p824_p1 }
  0x2b   :  { %834 = shalt.err (!%p831_p5)
}
  0x2c   :  { %s847_s0 = smov 64   ;;  %s848_s20 = smov 4  }
  0x2d   :  { %64 = dma.hbm_to_vmem [thread:$0]  %s919_s5, 2048, %s59_s18, [#allocation8], %s847_s0, %s847_s0, %s848_s20  }
  0x2e   :  { %835 = dma.done.wait [#allocation3], 128  }
  0x2f   :  { %836 = vsyncadd [#allocation3], 4294967168 }
  0x30   :  { %837 = dma.done.wait [#allocation5], 4608  }
  0x31   :  { %838 = vsyncadd [#allocation5], 4294962688 }
  0x32   :  { %839 = dma.done.wait [#allocation8], 2048  }
  0x33   :  { %840 = vsyncadd [#allocation8], 4294965248  ;;  %v849_v0 = vmov 0   ;;  %v685_v1 = vld [vmem:[#allocation4 + $0x14] ss:$8 sps:$4 sm:$0xff]   ;;  %vm118_vm0 = vcmask 261120   ;;  %v88_v51 = vlaneseq }
  0x34   :  { %154 = vmatprep.mubr.bf16.mxu0 %v849_v0  ;;  %v687_v2 = vld [vmem:[#allocation4 + $0x10] ss:$8 sps:$4 sm:$0xff]   ;;  %134 = vmatprep.subr.bf16.mxu0 %v685_v1  ;;  %v688_v3 = vld [vmem:[#allocation4 + $0x4] ss:$8 sps:$4 sm:$0xff]   ;;  %v690_v4 = vld [vmem:[#allocation4] ss:$8 sps:$4 sm:$0xff]  }
  0x35   :  { %v80_v5 = vld [vmem:[#allocation2] sm:$0xff]  ;;  %135 = vmatpush1.bf16.msra.mxu0 %v687_v2  ;;  %v694_v8 = vld [vmem:[#allocation6 + $0x64] ss:$8 sps:$4 sm:$0xff]   ;;  %v696_v10 = vld [vmem:[#allocation6 + $0x60] ss:$8 sps:$4 sm:$0xff]   ;;  %v89_v52 = vshrl.u32 %v88_v51, 7 }
  0x36   :  { %v691_v6 = vld [vmem:[#allocation6 + $0x74] ss:$8 sps:$4 sm:$0xff]   ;;  %136 = vmatprep.subr.bf16.mxu0 %v688_v3  ;;  %v693_v7 = vld [vmem:[#allocation6 + $0x70] ss:$8 sps:$4 sm:$0xff]   ;;  %v81_v9 = vpack.c.bf16 %v80_v5, %v80_v5  ;;  %v700_v13 = vld [vmem:[#allocation6 + $0x44] ss:$8 sps:$4 sm:$0xff]  }
  0x37   :  { %371 = vmatprep.subr.bf16.mxu1 %v691_v6  ;;  %v697_v11 = vld [vmem:[#allocation6 + $0x54] ss:$8 sps:$4 sm:$0xff]   ;;  %v699_v12 = vld [vmem:[#allocation6 + $0x50] ss:$8 sps:$4 sm:$0xff]   ;;  %v702_v14 = vld [vmem:[#allocation6 + $0x40] ss:$8 sps:$4 sm:$0xff]  }
  0x38   :  { %372 = vmatpush1.bf16.msra.mxu1 %v693_v7  ;;  %v703_v15 = vld [vmem:[#allocation6 + $0x34] ss:$8 sps:$4 sm:$0xff]   ;;  %v705_v16 = vld [vmem:[#allocation6 + $0x30] ss:$8 sps:$4 sm:$0xff]   ;;  %v706_v17 = vld [vmem:[#allocation6 + $0x24] ss:$8 sps:$4 sm:$0xff]  }
  0x39   :  { %137 = vmatpush1.bf16.msra.mxu0 %v690_v4  ;;  %373 = vmatprep.subr.bf16.mxu1 %v694_v8  ;;  %v708_v18 = vld [vmem:[#allocation6 + $0x20] ss:$8 sps:$4 sm:$0xff]   ;;  %v709_v19 = vld [vmem:[#allocation6 + $0x14] ss:$8 sps:$4 sm:$0xff]   ;;  %v711_v20 = vld [vmem:[#allocation6 + $0x10] ss:$8 sps:$4 sm:$0xff]  }
  0x3a   :  { %v712_v21 = vld [vmem:[#allocation6 + $0x4] ss:$8 sps:$4 sm:$0xff]   ;;  %v714_v22 = vld [vmem:[#allocation6] ss:$8 sps:$4 sm:$0xff]   ;;  %v715_v23 = vld [vmem:[#allocation6 + $0xf4] ss:$8 sps:$4 sm:$0xff]  }
  0x3b   :  { %v717_v24 = vld [vmem:[#allocation6 + $0xf0] ss:$8 sps:$4 sm:$0xff]   ;;  %v718_v25 = vld [vmem:[#allocation6 + $0xe4] ss:$8 sps:$4 sm:$0xff]   ;;  %v720_v26 = vld [vmem:[#allocation6 + $0xe0] ss:$8 sps:$4 sm:$0xff]  }
  0x3c   :  { %604 = vmatmul.mubr.msk.bf16.vlgmr.msra.gmra.mxu0 %vm118_vm0, %v81_v9  ;;  %374 = vmatpush1.bf16.msra.mxu1 %v696_v10  ;;  %v721_v27 = vld [vmem:[#allocation6 + $0xd4] ss:$8 sps:$4 sm:$0xff]   ;;  %v723_v28 = vld [vmem:[#allocation6 + $0xd0] ss:$8 sps:$4 sm:$0xff]   ;;  %v724_v29 = vld [vmem:[#allocation6 + $0xc4] ss:$8 sps:$4 sm:$0xff]  }
  0x3d   :  { %375 = vmatprep.subr.bf16.mxu1 %v697_v11  ;;  %v726_v30 = vld [vmem:[#allocation6 + $0xc0] ss:$8 sps:$4 sm:$0xff]   ;;  %v727_v31 = vld [vmem:[#allocation6 + $0xb4] ss:$8 sps:$4 sm:$0xff]   ;;  %v729_v32 = vld [vmem:[#allocation6 + $0xb0] ss:$8 sps:$4 sm:$0xff]  }
  0x3e   :  { %v730_v33 = vld [vmem:[#allocation6 + $0xa4] ss:$8 sps:$4 sm:$0xff]   ;;  %v732_v34 = vld [vmem:[#allocation6 + $0xa0] ss:$8 sps:$4 sm:$0xff]   ;;  %v733_v35 = vld [vmem:[#allocation6 + $0x94] ss:$8 sps:$4 sm:$0xff]  }
  0x3f   :  { %v735_v36 = vld [vmem:[#allocation6 + $0x90] ss:$8 sps:$4 sm:$0xff]   ;;  %v736_v37 = vld [vmem:[#allocation6 + $0x84] ss:$8 sps:$4 sm:$0xff]   ;;  %v738_v38 = vld [vmem:[#allocation6 + $0x80] ss:$8 sps:$4 sm:$0xff]  }
  0x40   :  { %376 = vmatpush1.bf16.msra.mxu1 %v699_v12  ;;  %v739_v39 = vld [vmem:[#allocation7 + $0x78] sm:$0xff]   ;;  %v741_v41 = vld [vmem:[#allocation7 + $0x70] sm:$0xff]   ;;  %v743_v43 = vld [vmem:[#allocation7 + $0x68] sm:$0xff]   ;;  %v90_v53 = vsub.s32 0, %v89_v52  ;;  %v94_v55 = vsub.s32 1, %v89_v52 }
  0x41   :  { %377 = vmatprep.subr.bf16.mxu1 %v700_v13  ;;  %v740_v40 = vld [vmem:[#allocation7 + $0x38] sm:$0xff]   ;;  %654 = vmatprep.subr.bf16.mxu0 %v739_v39  ;;  %v742_v42 = vld [vmem:[#allocation7 + $0x30] sm:$0xff]   ;;  %v744_v44 = vld [vmem:[#allocation7 + $0x28] sm:$0xff]  }
  0x42   :  { %655 = vmatpush3.bf16.msra.mxu0 %v740_v40  ;;  %v745_v45 = vld [vmem:[#allocation7 + $0x60] sm:$0xff]   ;;  %v747_v47 = vld [vmem:[#allocation7 + $0x58] sm:$0xff]   ;;  %v749_v49 = vld [vmem:[#allocation7 + $0x50] sm:$0xff]  }
  0x43   :  { %656 = vmatprep.subr.bf16.mxu0 %v741_v41  ;;  %v746_v46 = vld [vmem:[#allocation7 + $0x20] sm:$0xff]   ;;  %v748_v48 = vld [vmem:[#allocation7 + $0x18] sm:$0xff]   ;;  %v750_v50 = vld [vmem:[#allocation7 + $0x10] sm:$0xff]  }
  0x44   :  { %378 = vmatpush1.bf16.msra.mxu1 %v702_v14  ;;  %v86_v54 = vld [vmem:[%s916_s2] sm:$0x3]  ;;  %v751_v4 = vld [vmem:[#allocation7 + $0x48] sm:$0xff]   ;;  %v753_v6 = vld [vmem:[#allocation7 + $0x40] sm:$0xff]  }
  0x45   :  { %379 = vmatprep.subr.bf16.mxu1 %v703_v15  ;;  %v91_v56 = vrot.slane %v86_v54, %v90_v53  ;;  %v95_v57 = vrot.slane %v86_v54, %v94_v55  ;;  %v752_v5 = vld [vmem:[#allocation7 + $0x8] sm:$0xff]   ;;  %v754_v7 = vld [vmem:[#allocation7] sm:$0xff]   ;;  %v199_v8 = vld [vmem:[%s918_s4] sm:$0x3] }
  0x46   :  { %657 = vmatpush3.bf16.msra.mxu0 %v742_v42  ;;  %v204_v9 = vrot.slane %v199_v8, %v90_v53  ;;  %v208_v10 = vrot.slane %v199_v8, %v94_v55 }
  0x47   :  { %658 = vmatprep.subr.bf16.mxu0 %v743_v43 }
  0x48   :  { %380 = vmatpush1.bf16.msra.mxu1 %v705_v16 }
  0x49   :  { %381 = vmatprep.subr.bf16.mxu1 %v706_v17 }
  0x4a   :  { %659 = vmatpush3.bf16.msra.mxu0 %v744_v44 }
  0x4b   :  { %660 = vmatprep.subr.bf16.mxu0 %v745_v45 }
  0x4c   :  { %382 = vmatpush1.bf16.msra.mxu1 %v708_v18 }
  0x4d   :  { %383 = vmatprep.subr.bf16.mxu1 %v709_v19 }
  0x4e   :  { %661 = vmatpush3.bf16.msra.mxu0 %v746_v46 }
  0x4f   :  { %662 = vmatprep.subr.bf16.mxu0 %v747_v47 }
  0x50   :  { %384 = vmatpush1.bf16.msra.mxu1 %v711_v20 }
  0x51   :  { %385 = vmatprep.subr.bf16.mxu1 %v712_v21 }
  0x52   :  { %663 = vmatpush3.bf16.msra.mxu0 %v748_v48 }
  0x53   :  { %664 = vmatprep.subr.bf16.mxu0 %v749_v49 }
  0x54   :  { %386 = vmatpush1.bf16.msra.mxu1 %v714_v22  ;;  %v637_v22 = vld [vmem:[%s920_s6] ss:$0 sm:$0xff] }
  0x55   :  { %387 = vmatprep.subr.bf16.mxu1 %v715_v23 }
  0x56   :  { %665 = vmatpush3.bf16.msra.mxu0 %v750_v50 }
  0x57   :  { %666 = vmatprep.subr.bf16.mxu0 %v751_v4 }
  0x58   :  { %388 = vmatpush2.bf16.msra.mxu1 %v717_v24 }
  0x59   :  { %389 = vmatprep.subr.bf16.mxu1 %v718_v25 }
  0x5a   :  { %667 = vmatpush3.bf16.msra.mxu0 %v752_v5 }
  0x5b   :  { %668 = vmatprep.subr.bf16.mxu0 %v753_v6 }
  0x5c   :  { %390 = vmatpush2.bf16.msra.mxu1 %v720_v26 }
  0x5d   :  { %391 = vmatprep.subr.bf16.mxu1 %v721_v27 }
  0x5e   :  { %669 = vmatpush3.bf16.msra.mxu0 %v754_v7 }
  0x60   :  { %392 = vmatpush2.bf16.msra.mxu1 %v723_v28 }
  0x61   :  { %393 = vmatprep.subr.bf16.mxu1 %v724_v29 }
  0x64   :  { %394 = vmatpush2.bf16.msra.mxu1 %v726_v30 }
  0x65   :  { %395 = vmatprep.subr.bf16.mxu1 %v727_v31 }
  0x68   :  { %396 = vmatpush2.bf16.msra.mxu1 %v729_v32 }
  0x69   :  { %397 = vmatprep.subr.bf16.mxu1 %v730_v33 }
  0x6c   :  { %398 = vmatpush2.bf16.msra.mxu1 %v732_v34 }
  0x6d   :  { %399 = vmatprep.subr.bf16.mxu1 %v733_v35 }
  0x70   :  { %400 = vmatpush2.bf16.msra.mxu1 %v735_v36 }
  0x71   :  { %401 = vmatprep.subr.bf16.mxu1 %v736_v37 }
  0x74   :  { %402 = vmatpush2.bf16.msra.mxu1 %v738_v38 }
  0xfc   :  { %v156_v58 = vpop.f32.mrf.mxu0 }
  0xfd   :  { %v157_v59 = vadd.f32 %v156_v58, %v91_v56 }
  0xfe   :  { %v158_v60 = vpop.f32.mrf.mxu0 }
  0xff   :  { %v159_v61 = vadd.f32 %v158_v60, %v95_v57  ;;  %v163_v62 = vmax.f32 %v157_v59, 0.0 }
 0x100   :  { %v160_v63 = vpop.f32.mrf.mxu0 }
 0x101   :  { %v164_v0 = vmax.f32 %v159_v61, 0.0  ;;  %v165_v3 = vpack.c.bf16 %v163_v62, %v163_v62 }
 0x102   :  { %v161_v1 = vpop.f32.mrf.mxu0 }
 0x103   :  { %v166_v2 = vpack.c.bf16 %v164_v0, %v164_v0 }
 0x105   :  { %403 = vmatprep.mubr.bf16.mxu1 %v166_v2 }
 0x106   :  { %404 = vmatmul.mubr.bf16.vlgmr.msra.gmra.mxu1 %v165_v3 }
 0x1c6   :  { %v405_v11 = vpop.f32.mrf.mxu1 }
 0x1c7   :  { %v406_v12 = vadd.f32 %v405_v11, %v204_v9 }
 0x1c8   :  { %v407_v13 = vpop.f32.mrf.mxu1 }
 0x1c9   :  { %v408_v14 = vadd.f32 %v407_v13, %v208_v10  ;;  %v412_v15 = vmax.f32 %v406_v12, 0.0 }
 0x1ca   :  { %v409_v16 = vpop.f32.mrf.mxu1 }
 0x1cb   :  { %v413_v17 = vmax.f32 %v408_v14, 0.0  ;;  %v414_v20 = vpack.c.bf16 %v412_v15, %v412_v15 }
 0x1cc   :  { %v410_v18 = vpop.f32.mrf.mxu1 }
 0x1cd   :  { %v415_v19 = vpack.c.bf16 %v413_v17, %v413_v17 }
 0x1cf   :  { %583 = vmatprep.mubr.bf16.mxu0 %v415_v19 }
 0x1d0   :  { %584 = vmatmul.mubr.bf16.vlgmr.msra.gmra.mxu0 %v414_v20 }
 0x290   :  { %v670_v21 = vpop.f32.mrf.mxu0 }
 0x292   :  { %v671_v23 = vpop.f32.mrf.mxu0 }
 0x293   :  { %v672_v24 = vadd.f32 %v671_v23, %v670_v21 }
 0x294   :  { %v673_v25 = vpop.f32.mrf.mxu0 }
 0x295   :  { %v586_v26 = vadd.f32 %v672_v24, %v637_v22 }
 0x296   :  { %v674_v27 = vpop.f32.mrf.mxu0 }
 0x297   :  { %v591_v28 = vpack.c.bf16 %v586_v26, %v586_v26 }
 0x299   :  { %592 = vst [vmem:[%s921_s7] sm:$0xf] %v591_v28 }
 0x29a   :  { %597 = vsyncpa [#allocation3], 1 }
 0x29b   :  { %598 = vsyncpa [#allocation5], 1 }
 0x29c   :  { %599 = vsyncpa [#allocation8], 1 }

</bundles_post_ra>
